<compile_context>
chip_gen: v7x
topology: tpu7x:2x2x1
jax: 0.10.0
libtpu: 0.0.40
codegen_flags: <defaults>
</compile_context>

<pallas_src>
import math

import jax
import jax.numpy as jnp
from jax.experimental import pallas as pl
from jax.experimental.pallas import tpu as pltpu


# ---------------------------------------------------------------------------
# Pallas kernel: one-shot  (tm, K) @ (K, tn) + bias(1, tn)  with f32 accumulate
# ---------------------------------------------------------------------------
def _proj_kernel(p_ref, w_ref, b_ref, o_ref):
    acc = jnp.dot(p_ref[...], w_ref[...], preferred_element_type=jnp.float32)
    o_ref[...] = (acc + b_ref[...]).astype(o_ref.dtype)


def _round_up(x, m):
    return (x + m - 1) // m * m


def _pick_tile(dim, candidates):
    for c in candidates:
        if dim % c == 0:
            return c
    return dim


def _matmul_bias(patches, w, bias, out_dtype, compute_dtype=jnp.bfloat16):
    """out = patches @ w + bias, via a single-pass Pallas matmul kernel.

    patches: (M, K), w: (K, N), bias: (N,).  Operands are cast to
    `compute_dtype` (bf16 by default: native MXU rate, half the HBM traffic);
    accumulation and the bias add stay in f32.
    """
    M, K = patches.shape
    _, N = w.shape

    # Pad K / N to lane multiples (unmasked, lane-dense vector loads/stores).
    K_pad = _round_up(K, 128)
    N_pad = _round_up(N, 128)

    # M tiling: big tiles amortize per-step pipeline overhead; small problems
    # just become a single tile (padded to a sublane multiple).
    if M >= 512:
        tm = 512
    elif M >= 256:
        tm = 256
    else:
        tm = _round_up(M, 8)
    # Guard VMEM for unusually large K (PatchEmbed K is <= 768 normally).
    while tm > 64 and tm * K_pad * 2 * 2 > (8 << 20):
        tm //= 2
    M_pad = _round_up(M, tm)

    # Full-N tile whenever it fits comfortably -> weight resident in VMEM,
    # one lane-dense store per M tile.
    tn = N_pad if N_pad <= 1024 else _pick_tile(N_pad, (1024, 512, 256, 128))

    p = jnp.pad(patches.astype(compute_dtype), ((0, M_pad - M), (0, K_pad - K)))
    wp = jnp.pad(w.astype(compute_dtype), ((0, K_pad - K), (0, N_pad - N)))
    bp = jnp.pad(bias.astype(jnp.float32), (0, N_pad - N)).reshape(1, N_pad)

    out = pl.pallas_call(
        _proj_kernel,
        out_shape=jax.ShapeDtypeStruct((M_pad, N_pad), out_dtype),
        grid_spec=pltpu.PrefetchScalarGridSpec(
            num_scalar_prefetch=0,
            grid=(M_pad // tm, N_pad // tn),
            in_specs=[
                # Patches: new M tile per i, full K in one block (no K loop).
                pl.BlockSpec((tm, K_pad), lambda i, j: (i, 0)),
                # Weight: constant block index over i -> DMA'd once, resident.
                pl.BlockSpec((K_pad, tn), lambda i, j: (0, j)),
                # Bias: constant block index over i -> DMA'd once.
                pl.BlockSpec((1, tn), lambda i, j: (0, j)),
            ],
            out_specs=pl.BlockSpec((tm, tn), lambda i, j: (i, j)),
        ),
        compiler_params=pltpu.CompilerParams(
            dimension_semantics=("parallel", "parallel"),
        ),
    )(p, wp, bp)

    return out[:M, :N]


# ---------------------------------------------------------------------------
# Wrapper: im2col (layout plumbing) + Pallas projection
# ---------------------------------------------------------------------------
def _extract_patches(x, patch_size, stride_size):
    """x (B, C, H, W) -> (B*num_patches, C*ph*pw), row-major over (ny, nx)."""
    B, C, H, W = x.shape
    ph, pw = patch_size
    sh, sw = stride_size
    num_y = (H - ph) // sh + 1
    num_x = (W - pw) // sw + 1

    if (ph, pw) == (sh, sw) and H == num_y * ph and W == num_x * pw:
        # Non-overlapping patches: pure reshape (+ one transpose for NCHW input).
        p = x.reshape(B, C, num_y, ph, num_x, pw)
    else:
        # Overlapping patches: gather window rows / cols in the wrapper.
        # TODO(synk): fuse this im2col into the kernel (x in HBM via
        # memory_space=pl.ANY + manual strip DMA) to avoid materializing the
        # (ph*pw)/(sh*sw)-inflated patch matrix in HBM.
        row_idx = (jnp.arange(num_y)[:, None] * sh + jnp.arange(ph)[None, :]).reshape(-1)
        col_idx = (jnp.arange(num_x)[:, None] * sw + jnp.arange(pw)[None, :]).reshape(-1)
        p = jnp.take(x, row_idx, axis=2).reshape(B, C, num_y, ph, W)
        p = jnp.take(p, col_idx, axis=4).reshape(B, C, num_y, ph, num_x, pw)

    p = p.transpose(0, 2, 4, 1, 3, 5)  # (B, ny, nx, C, ph, pw)
    return p.reshape(B * num_y * num_x, C * ph * pw), num_y, num_x


def patch_embed_forward(x, weight, bias, patch_size, stride_size):
    """Equivalent of Conv2d(k=patch, s=stride) -> flatten(2) -> transpose(1,2)."""
    B = x.shape[0]
    E, C, ph, pw = weight.shape

    patches, num_y, num_x = _extract_patches(x, patch_size, stride_size)
    w_flat = weight.reshape(E, C * ph * pw).T          # (K, E)
    out = _matmul_bias(patches, w_flat, bias, x.dtype)  # (B*num_patches, E)
    return out.reshape(B, num_y * num_x, E)


def _to_2tuple(v):
    if isinstance(v, (tuple, list)):
        return tuple(v)
    return (v, v)


class PatchEmbed:
    """Mirror of the PyTorch PatchEmbed module (stem_conv=False path)."""

    def __init__(self, img_size=224, patch_size=16, stride_size=16, in_chans=3,
                 embed_dim=768, stem_conv=False, *, key, param_dtype=jnp.float32):
        img_size = _to_2tuple(img_size)
        patch_size = _to_2tuple(patch_size)
        stride_size = _to_2tuple(stride_size)
        self.num_x = (img_size[1] - patch_size[1]) // stride_size[1] + 1
        self.num_y = (img_size[0] - patch_size[0]) // stride_size[0] + 1
        self.num_patches = self.num_x * self.num_y
        self.img_size = img_size
        self.patch_size = patch_size
        self.stride_size = stride_size
        self.embed_dim = embed_dim

        if stem_conv:
            # TODO(synk): stem_conv branch (Conv/IBN/BatchNorm/ReLU stack) not implemented.
            raise NotImplementedError("stem_conv=True is not supported in this Pallas port")

        kw, kb = jax.random.split(key)
        fan_in = in_chans * patch_size[0] * patch_size[1]
        bound = 1.0 / math.sqrt(fan_in)
        self.weight = jax.random.uniform(
            kw, (embed_dim, in_chans, patch_size[0], patch_size[1]),
            minval=-bound, maxval=bound, dtype=param_dtype)
        self.bias = jax.random.uniform(
            kb, (embed_dim,), minval=-bound, maxval=bound, dtype=param_dtype)

    def __call__(self, x):
        return patch_embed_forward(x, self.weight, self.bias,
                                   self.patch_size, self.stride_size)


# ---------------------------------------------------------------------------
# Self-test
# ---------------------------------------------------------------------------
def _reference(x, weight, bias, stride):
    E = weight.shape[0]
    y = jax.lax.conv_general_dilated(
        x, weight, window_strides=stride, padding="VALID",
        dimension_numbers=("NCHW", "OIHW", "NCHW"),
        precision=jax.lax.Precision.HIGHEST)
    y = y + bias.reshape(1, E, 1, 1)
    B = x.shape[0]
    return y.reshape(B, E, -1).transpose(0, 2, 1)


if __name__ == "__main__":
    root = jax.random.PRNGKey(0)
    kx, kp, kp2 = jax.random.split(root, 3)

    # Small ViT-style config: 32x32 image, 8x8 patches, embed_dim=128.
    B, C, H, W = 2, 3, 32, 32
    patch, stride, embed = 8, 8, 128
    x = jax.random.normal(kx, (B, C, H, W), dtype=jnp.float32)

    # --- non-overlapping patches (default stride == patch) ---
    module = PatchEmbed(img_size=(H, W), patch_size=patch, stride_size=stride,
                        in_chans=C, embed_dim=embed, key=kp)
    y = jax.block_until_ready(module(x))
    assert y.shape == (B, module.num_patches, embed)
    y_ref = _reference(x, module.weight, module.bias, (stride, stride))
    err = float(jnp.max(jnp.abs(y - y_ref)))
    assert jnp.allclose(y, y_ref, atol=3e-2, rtol=3e-2), err

    # --- overlapping patches (stride < patch) exercises the gather im2col ---
    module2 = PatchEmbed(img_size=(H, W), patch_size=patch, stride_size=4,
                         in_chans=C, embed_dim=embed, key=kp2)
    y2 = jax.block_until_ready(module2(x))
    assert y2.shape == (B, module2.num_patches, embed)
    y2_ref = _reference(x, module2.weight, module2.bias, (4, 4))
    err2 = float(jnp.max(jnp.abs(y2 - y2_ref)))
    assert jnp.allclose(y2, y2_ref, atol=3e-2, rtol=3e-2), err2

    print("KERNEL_OK")
</pallas_src>

<mosaic_0001>
module attributes {stable_mosaic.version = 11 : i64} {
  func.func @_proj_kernel(%arg0: i32, %arg1: i32, %arg2: memref<32x256xbf16, #tpu.memory_space<vmem>>, %arg3: memref<256x128xbf16, #tpu.memory_space<vmem>>, %arg4: memref<1x128xf32, #tpu.memory_space<vmem>>, %arg5: memref<32x128xf32, #tpu.memory_space<vmem>>) attributes {dimension_semantics = [#tpu.dimension_semantics<parallel>, #tpu.dimension_semantics<parallel>], iteration_bounds = array<i64: 1, 1>, scalar_prefetch = 0 : i64, scratch_operands = 0 : i64, tpu.core_type = #tpu.core_type<tc>, window_params = [{transform_indices = @transform_0, window_bounds = array<i64: 32, 256>}, {transform_indices = @transform_1, window_bounds = array<i64: 256, 128>}, {transform_indices = @transform_2, window_bounds = array<i64: 1, 128>}, {transform_indices = @transform_3, window_bounds = array<i64: 32, 128>}]} {
    %c0 = arith.constant 0 : index
    %c0_0 = arith.constant 0 : index
    %0 = vector.load %arg2[%c0, %c0_0] : memref<32x256xbf16, #tpu.memory_space<vmem>>, vector<32x256xbf16>
    %c0_1 = arith.constant 0 : index
    %c0_2 = arith.constant 0 : index
    %1 = vector.load %arg3[%c0_1, %c0_2] : memref<256x128xbf16, #tpu.memory_space<vmem>>, vector<256x128xbf16>
    %cst = arith.constant dense<0.000000e+00> : vector<32x128xf32>
    %2 = tpu.matmul %0, %1, %cst {dimension_numbers = #tpu.dot_dimension_numbers<[1], [0], [0], [1], [0, 0, 1, 1], [], []>} : vector<32x256xbf16>, vector<256x128xbf16>, vector<32x128xf32> -> vector<32x128xf32>
    %c0_3 = arith.constant 0 : index
    %c0_4 = arith.constant 0 : index
    %3 = vector.load %arg4[%c0_3, %c0_4] : memref<1x128xf32, #tpu.memory_space<vmem>>, vector<1x128xf32>
    %4 = vector.broadcast %3 : vector<1x128xf32> to vector<32x128xf32>
    %5 = arith.addf %2, %4 : vector<32x128xf32>
    %c0_5 = arith.constant 0 : index
    %c0_6 = arith.constant 0 : index
    %6 = vector.load %arg5[%c0_5, %c0_6] : memref<32x128xf32, #tpu.memory_space<vmem>>, vector<32x128xf32>
    tpu.vector_store %arg5[%c0_5, %c0_6], %5 {strides = array<i32>} : memref<32x128xf32, #tpu.memory_space<vmem>>, vector<32x128xf32>,
    return
  }
  func.func @transform_0(%arg0: i32, %arg1: i32) -> (i32, i32) {
    %c0_i32 = arith.constant 0 : i32
    %c0_i32_0 = arith.constant 0 : i32
    return %arg0, %c0_i32 : i32, i32
  }
  func.func @transform_1(%arg0: i32, %arg1: i32) -> (i32, i32) {
    %c0_i32 = arith.constant 0 : i32
    %c0_i32_0 = arith.constant 0 : i32
    return %c0_i32, %arg1 : i32, i32
  }
  func.func @transform_2(%arg0: i32, %arg1: i32) -> (i32, i32) {
    %c0_i32 = arith.constant 0 : i32
    %c0_i32_0 = arith.constant 0 : i32
    return %c0_i32, %arg1 : i32, i32
  }
  func.func @transform_3(%arg0: i32, %arg1: i32) -> (i32, i32) {
    %c0_i32 = arith.constant 0 : i32
    return %arg0, %arg1 : i32, i32
  }
}

</mosaic_0001>

<bundles_post_ra>
// kernel: tpu_custom_call.1
= control target key start
LH: loop header
LB: loop body
LE: loop exit
PB: predicated region body
PF: predicated region fallthrough
CT: control target
= control target key end

     0   :  { %8 = vsyncpa [#allocation3], 0  ;;  %s512_s0 = inlined_call_operand.hbm [shape: bf16[32,256], index: 0, kind: input, shape index: {}]   ;;  %s513_s1 = inlined_call_operand.hbm [shape: bf16[256,128], index: 1, kind: input, shape index: {}]   ;;  %s514_s2 = inlined_call_operand.vmem [shape: f32[1,128], index: 2, kind: input, shape index: {}]   ;;  %s515_s3 = inlined_call_operand.hbm [shape: f32[32,128], index: 3, kind: output, shape index: {}]  }
   0x1   :  { %9 = vsyncpa [#allocation6], 0 }
   0x2   :  { %10 = vsyncpa [#allocation4], 0  ;;  %s440_s12 = smov [#allocation2]   ;;  %s368_s16 = scalar_lea.hbm %s512_s0, 512 }
   0x3   :  { %s16_s13 = sshll.u32 %s440_s12, 4  ;;  %p369_p0 = scmp.ne.s32.totalorder %s512_s0, %s368_s16  ;;  %s17_s13 = int_to_ptr.vmem [resolvable:$true] %s16_s13 }
   0x4   :  { %p372_p1 = scmp.lt.u32.totalorder %s368_s16, %s512_s0 }
   0x6   :  { %p374_p2 = pnand %p372_p1, %p369_p0 }
   0x8   :  { %377 = shalt.err (!%p374_p2)
}
   0x9   :  { %s378_s21 = scalar_lea.vmem %s17_s13, 512  ;;  %p383_p4 = scmp.lt.s32.totalorder %s17_s13, %s17_s13 }
   0xa   :  { %p379_p3 = scmp.ne.s32.totalorder %s17_s13, %s378_s21  ;;  %p384_p5 = scmp.lt.s32.totalorder %s378_s21, %s378_s21 }
   0xc   :  { %p385_p6 = por %p384_p5, %p383_p4 }
   0xe   :  { %p386_p7 = pnand %p385_p6, %p379_p3 }
  0x10   :  { %389 = shalt.err (!%p386_p7)
}
  0x11   :  { %s441_s22 = smov 128   ;;  %s442_s23 = smov 8  }
  0x12   :  { %22 = dma.hbm_to_vmem [thread:$0]  %s512_s0, 512, %s17_s13, [#allocation3], %s441_s22, %s441_s22, %s442_s23  }
  0x13   :  { %s443_s26 = smov [#allocation5]   ;;  %s390_s30 = scalar_lea.hbm %s513_s1, 2048 }
  0x14   :  { %s28_s27 = sshll.u32 %s443_s26, 4  ;;  %p391_p8 = scmp.ne.s32.totalorder %s513_s1, %s390_s30  ;;  %s29_s27 = int_to_ptr.vmem [resolvable:$true] %s28_s27 }
  0x15   :  { %p394_p9 = scmp.lt.u32.totalorder %s390_s30, %s513_s1 }
  0x17   :  { %p396_p10 = pnand %p394_p9, %p391_p8 }
  0x19   :  { %399 = shalt.err (!%p396_p10)
}
  0x1a   :  { %s400_s8 = scalar_lea.vmem %s29_s27, 2048  ;;  %p405_p12 = scmp.lt.s32.totalorder %s29_s27, %s29_s27 }
  0x1b   :  { %p401_p11 = scmp.ne.s32.totalorder %s29_s27, %s400_s8  ;;  %p406_p13 = scmp.lt.s32.totalorder %s400_s8, %s400_s8 }
  0x1d   :  { %p407_p0 = por %p406_p13, %p405_p12 }
  0x1f   :  { %p408_p1 = pnand %p407_p0, %p401_p11 }
  0x21   :  { %411 = shalt.err (!%p408_p1)
}
  0x22   :  { %s444_s0 = smov 64   ;;  %s445_s9 = smov 4  }
  0x23   :  { %34 = dma.hbm_to_vmem [thread:$0]  %s513_s1, 2048, %s29_s27, [#allocation6], %s444_s0, %s444_s0, %s445_s9  }
  0x24   :  { %434 = dma.done.wait [#allocation3], 512  }
  0x25   :  { %435 = vsyncadd [#allocation3], 4294966784 }
  0x26   :  { %436 = dma.done.wait [#allocation6], 2048  }
  0x27   :  { %437 = vsyncadd [#allocation6], 4294965248  ;;  %v346_v0 = vld [vmem:[#allocation5 + $0x40] sm:$0xff]   ;;  %v348_v2 = vld [vmem:[#allocation5 + $0x48] sm:$0xff]   ;;  %s446_s13 = smov [#allocation7]  }
  0x28   :  { %v347_v1 = vld [vmem:[#allocation5] sm:$0xff]   ;;  %295 = vmatprep.subr.bf16.mxu0 %v346_v0  ;;  %323 = vmatprep.subr.bf16.mxu1 %v346_v0  ;;  %v349_v3 = vld [vmem:[#allocation5 + $0x8] sm:$0xff]   ;;  %v350_v4 = vld [vmem:[#allocation5 + $0x50] sm:$0xff]   ;;  %s261_s14 = sshll.u32 %s446_s13, 4  ;;  %s262_s14 = int_to_ptr.vmem [resolvable:$true] %s261_s14 }
  0x29   :  { %296 = vmatpush3.bf16.msra.mxu0 %v347_v1  ;;  %331 = vmatpush3.bf16.msra.mxu1 %v347_v1  ;;  %v351_v5 = vld [vmem:[#allocation5 + $0x10] sm:$0xff]   ;;  %v352_v6 = vld [vmem:[#allocation5 + $0x58] sm:$0xff]   ;;  %v354_v8 = vld [vmem:[#allocation5 + $0x60] sm:$0xff]   ;;  %p417_p3 = scmp.lt.s32.totalorder %s262_s14, %s262_s14 }
  0x2a   :  { %297 = vmatprep.subr.bf16.mxu0 %v348_v2  ;;  %324 = vmatprep.subr.bf16.mxu1 %v348_v2  ;;  %v353_v7 = vld [vmem:[#allocation5 + $0x18] sm:$0xff]   ;;  %v355_v9 = vld [vmem:[#allocation5 + $0x20] sm:$0xff]   ;;  %v356_v10 = vld [vmem:[#allocation5 + $0x68] sm:$0xff]  }
  0x2b   :  { %v364_v11 = vld [vmem:[#allocation2 + $0x4] ss:$8 sps:$4 sm:$0xff]   ;;  %v367_v12 = vld [vmem:[#allocation2 + $0x14] ss:$8 sps:$4 sm:$0xff]   ;;  %v362_v18 = vld [vmem:[#allocation2] ss:$8 sps:$4 sm:$0xff]  }
  0x2c   :  { %v357_v13 = vld [vmem:[#allocation5 + $0x28] sm:$0xff]   ;;  %v358_v14 = vld [vmem:[#allocation5 + $0x70] sm:$0xff]   ;;  %235 = vmatprep.mubr.bf16.mxu0 %v364_v11  ;;  %243 = vmatprep.mubr.bf16.mxu1 %v367_v12  ;;  %v360_v16 = vld [vmem:[#allocation5 + $0x78] sm:$0xff]  }
  0x2d   :  { %298 = vmatpush3.bf16.msra.mxu0 %v349_v3  ;;  %332 = vmatpush3.bf16.msra.mxu1 %v349_v3  ;;  %v359_v15 = vld [vmem:[#allocation5 + $0x30] sm:$0xff]   ;;  %v361_v17 = vld [vmem:[#allocation5 + $0x38] sm:$0xff]   ;;  %v274_v22 = vld [vmem:[%s514_s2] ss:$0 sm:$0xff]  ;;  %s412_s2 = scalar_lea.vmem %s262_s14, 512 }
  0x2e   :  { %299 = vmatprep.subr.bf16.mxu0 %v350_v4  ;;  %325 = vmatprep.subr.bf16.mxu1 %v350_v4  ;;  %v365_v19 = vld [vmem:[#allocation2 + $0x10] ss:$8 sps:$4 sm:$0xff]   ;;  %p413_p2 = scmp.ne.s32.totalorder %s262_s14, %s412_s2  ;;  %p418_p4 = scmp.lt.s32.totalorder %s412_s2, %s412_s2 }
  0x30   :  { %p419_p5 = por %p418_p4, %p417_p3 }
  0x31   :  { %300 = vmatpush3.bf16.msra.mxu0 %v351_v5  ;;  %333 = vmatpush3.bf16.msra.mxu1 %v351_v5 }
  0x32   :  { %301 = vmatprep.subr.bf16.mxu0 %v352_v6  ;;  %326 = vmatprep.subr.bf16.mxu1 %v352_v6  ;;  %p420_p6 = pnand %p419_p5, %p413_p2 }
  0x35   :  { %302 = vmatpush3.bf16.msra.mxu0 %v353_v7  ;;  %334 = vmatpush3.bf16.msra.mxu1 %v353_v7 }
  0x36   :  { %303 = vmatprep.subr.bf16.mxu0 %v354_v8  ;;  %327 = vmatprep.subr.bf16.mxu1 %v354_v8 }
  0x39   :  { %304 = vmatpush3.bf16.msra.mxu0 %v355_v9  ;;  %335 = vmatpush3.bf16.msra.mxu1 %v355_v9 }
  0x3a   :  { %305 = vmatprep.subr.bf16.mxu0 %v356_v10  ;;  %328 = vmatprep.subr.bf16.mxu1 %v356_v10 }
  0x3d   :  { %306 = vmatpush3.bf16.msra.mxu0 %v357_v13  ;;  %336 = vmatpush3.bf16.msra.mxu1 %v357_v13 }
  0x3e   :  { %307 = vmatprep.subr.bf16.mxu0 %v358_v14  ;;  %329 = vmatprep.subr.bf16.mxu1 %v358_v14 }
  0x41   :  { %308 = vmatpush3.bf16.msra.mxu0 %v359_v15  ;;  %337 = vmatpush3.bf16.msra.mxu1 %v359_v15 }
  0x42   :  { %309 = vmatprep.subr.bf16.mxu0 %v360_v16  ;;  %330 = vmatprep.subr.bf16.mxu1 %v360_v16 }
  0x45   :  { %310 = vmatpush3.bf16.msra.mxu0 %v361_v17  ;;  %338 = vmatpush3.bf16.msra.mxu1 %v361_v17 }
  0x48   :  { %236 = vmatmul.mubr.bf16.vlgmr.msra.gmra.mrb[0].mxu0 %v362_v18  ;;  %244 = vmatmul.mubr.bf16.vlgmr.msra.gmra.mrb[0].mxu1 %v365_v19 }
 0x11b   :  { %v311_v20 = vpop.f32.mrb[0].mxu0  ;;  %v317_v21 = vpop.f32.mrb[0].mxu1 }
 0x11c   :  { %v312_v23 = vpop.f32.mrb[1].mxu0  ;;  %v318_v24 = vpop.f32.mrb[1].mxu1 }
 0x11d   :  { %v313_v25 = vadd.f32 %v312_v23, %v311_v20  ;;  %v319_v26 = vadd.f32 %v318_v24, %v317_v21  ;;  %v314_v27 = vpop.f32.mrb[2].mxu0  ;;  %v320_v28 = vpop.f32.mrb[2].mxu1 }
 0x11e   :  { %v315_v29 = vpop.f32.mrb[3].mxu0  ;;  %v321_v30 = vpop.f32.mrb[3].mxu1 }
 0x11f   :  { %v238_v31 = vadd.f32 %v313_v25, %v274_v22  ;;  %v246_v32 = vadd.f32 %v319_v26, %v274_v22  ;;  %v316_v33 = vadd.f32 %v315_v29, %v314_v27  ;;  %v322_v34 = vadd.f32 %v321_v30, %v320_v28 }
 0x121   :  { %252 = vst [vmem:[#allocation7] sm:$0xff] %v238_v31  ;;  %254 = vst [vmem:[#allocation7 + $0x10] sm:$0xff] %v246_v32  ;;  %v241_v35 = vadd.f32 %v316_v33, %v274_v22  ;;  %v249_v36 = vadd.f32 %v322_v34, %v274_v22 }
 0x123   :  { %253 = vst [vmem:[#allocation7 + $0x8] sm:$0xff] %v241_v35  ;;  %255 = vst [vmem:[#allocation7 + $0x18] sm:$0xff] %v249_v36 }
 0x124   :  { %423 = shalt.err (!%p420_p6)
}
 0x125   :  { %s424_s17 = scalar_lea.hbm %s515_s3, 512 }
 0x126   :  { %p425_p7 = scmp.ne.s32.totalorder %s515_s3, %s424_s17  ;;  %p428_p8 = scmp.lt.u32.totalorder %s424_s17, %s515_s3 }
 0x128   :  { %p430_p9 = pnand %p428_p8, %p425_p7 }
 0x12a   :  { %433 = shalt.err (!%p430_p9)
}
 0x12b   :  { %267 = dma.vmem_to_hbm [thread:$0]  %s262_s14, 512, %s515_s3, [#allocation4], %s441_s22, %s441_s22, %s442_s23  }
 0x12c   :  { %438 = dma.done.wait [#allocation4], 512  }
 0x12d   :  { %439 = vsyncadd [#allocation4], 4294966784 }
 0x12e   :  { %271 = vsyncpa [#allocation3], 1 }
 0x12f   :  { %272 = vsyncpa [#allocation6], 1 }
 0x130   :  { %273 = vsyncpa [#allocation4], 1 }

</bundles_post_ra>
